<compile_context>
chip_gen: v5e
topology: v5e:2x2
jax: 0.10.0
libtpu: 0.0.40
codegen_flags: <defaults>
</compile_context>

<pallas_src>
import functools

import jax
import jax.numpy as jnp
from jax.experimental import pallas as pl
from jax.experimental.pallas import tpu as pltpu


def _outconv_kernel(xh_ref, xl_ref, wh_ref, wl_ref, u_ref, o_ref):
    """One (image, row-block): y = W_h @ x_h + W_l @ up2x(x_l), spatial flattened in lanes."""
    xh = xh_ref[0]                       # (C_h, th*W)
    xl = xl_ref[0]                       # (C_l, (th/2)*(W/2))
    # Fused 2x nearest upsample: 0/1 selection matmul, stays in VMEM, exact
    # (each output column picks exactly one xl value).
    xl_up = jnp.dot(xl, u_ref[...], preferred_element_type=jnp.float32)
    xl_up = xl_up.astype(xl_ref.dtype)   # exact round-trip of the selected values
    # 1x1 convs == channel matmuls; f32 accumulation on the MXU.
    acc = jnp.dot(wh_ref[...], xh, preferred_element_type=jnp.float32)
    acc = acc + jnp.dot(wl_ref[...], xl_up, preferred_element_type=jnp.float32)
    o_ref[0] = acc.astype(o_ref.dtype)   # (out_ch, th*W): lane-dense store


def _pick_row_tile(H, W, max_lanes):
    """Rows per grid step.  Whole image if it fits the lane budget; otherwise the largest even
    divisor of H keeping both the high (th*W) and low (th*W/4) blocks 128-lane aligned."""
    if H * W <= max_lanes:
        return H
    cands = [th for th in range(2, H, 2)
             if H % th == 0 and (th * W) % 512 == 0 and th * W <= max_lanes]
    return max(cands) if cands else H    # full-height block is always BlockSpec-legal


@functools.partial(jax.jit, static_argnames=("compute_dtype", "max_block_lanes"))
def outconv_pallas(x_h, x_l, w_h2h, w_l2h, *, compute_dtype=jnp.bfloat16,
                   max_block_lanes=2048):
    """x_h: (N, C_h, H, W); x_l: (N, C_l, H/2, W/2); weights (out_ch, C[, 1, 1]); bias=False."""
    N, Ch, H, W = x_h.shape
    Nl, Cl, Hl, Wl = x_l.shape
    if not (Nl == N and 2 * Hl == H and 2 * Wl == W):
        raise ValueError("x_l must be the half-resolution octave branch of x_h")
    w_h2h = w_h2h.reshape(w_h2h.shape[0], Ch)     # accepts (O, C) or (O, C, 1, 1)
    w_l2h = w_l2h.reshape(w_l2h.shape[0], Cl)
    out_ch = w_h2h.shape[0]
    out_dtype = x_h.dtype

    th = _pick_row_tile(H, W, max_block_lanes)    # high-res rows per grid step (even)
    thl = th // 2
    L, Ll = th * W, thl * Wl                      # flattened lanes per block (high / low)

    # Metadata-only reshapes: stay NCHW, just flatten spatial into the lane dim.
    xh = x_h.reshape(N, Ch, H * W).astype(compute_dtype)
    xl = x_l.reshape(N, Cl, Hl * Wl).astype(compute_dtype)
    wh = w_h2h.astype(compute_dtype)
    wl = w_l2h.astype(compute_dtype)

    # Block-local nearest-upsample operator: U[low_flat, high_flat] = 1 iff high pixel (r, c)
    # maps to low pixel (r//2, c//2).  Identical for every block (blocks cover whole rows).
    low_of_high = ((jnp.arange(th) // 2)[:, None] * Wl
                   + (jnp.arange(W) // 2)[None, :]).reshape(1, L)
    upsel = (jnp.arange(Ll)[:, None] == low_of_high).astype(compute_dtype)   # (Ll, L)

    grid = (N, H // th)
    nbytes = lambda a: a.size * a.dtype.itemsize
    cost = pl.CostEstimate(
        flops=2 * N * H * W * out_ch * (Ch + Cl) + 2 * N * (H // th) * Cl * Ll * L,
        transcendentals=0,
        bytes_accessed=(nbytes(xh) + nbytes(xl) + nbytes(wh) + nbytes(wl) + nbytes(upsel)
                        + N * out_ch * H * W * jnp.dtype(out_dtype).itemsize))

    out_flat = pl.pallas_call(
        _outconv_kernel,
        out_shape=jax.ShapeDtypeStruct((N, out_ch, H * W), out_dtype),
        grid_spec=pltpu.PrefetchScalarGridSpec(
            num_scalar_prefetch=0,
            grid=grid,
            in_specs=[
                pl.BlockSpec((1, Ch, L), lambda n, i: (n, 0, i)),      # high activations
                pl.BlockSpec((1, Cl, Ll), lambda n, i: (n, 0, i)),     # low activations (low res!)
                pl.BlockSpec((out_ch, Ch), lambda n, i: (0, 0)),       # W_h2h
                pl.BlockSpec((out_ch, Cl), lambda n, i: (0, 0)),       # W_l2h
                pl.BlockSpec((Ll, L), lambda n, i: (0, 0)),            # upsample selector
            ],
            out_specs=pl.BlockSpec((1, out_ch, L), lambda n, i: (n, 0, i)),
        ),
        compiler_params=pltpu.CompilerParams(
            dimension_semantics=("parallel", "parallel")),   # keep parallel for v7x's 2 TCs
        cost_estimate=cost,
    )(xh, xl, wh, wl, upsel)

    # OctaveConv(alpha_out=0) returns (y_h, None); OutConv forwards it — we return y_h.
    return out_flat.reshape(N, out_ch, H, W)


if __name__ == "__main__":
    key = jax.random.PRNGKey(0)
    in_ch, out_ch = 8, 3
    alpha_in = 0.25
    Cl = int(alpha_in * in_ch)          # 2
    Ch = in_ch - Cl                     # 6
    N, H, W = 2, 16, 16

    k1, k2, k3, k4 = jax.random.split(key, 4)
    x_h = jax.random.normal(k1, (N, Ch, H, W), jnp.float32)
    x_l = jax.random.normal(k2, (N, Cl, H // 2, W // 2), jnp.float32)
    w_h2h = 0.1 * jax.random.normal(k3, (out_ch, Ch, 1, 1), jnp.float32)   # bias=False
    w_l2h = 0.1 * jax.random.normal(k4, (out_ch, Cl, 1, 1), jnp.float32)

    y = outconv_pallas(x_h, x_l, w_h2h, w_l2h)
    y = jax.block_until_ready(y)
    assert y.shape == (N, out_ch, H, W) and y.dtype == x_h.dtype

    # Pure-JAX reference of the OctaveConv(1x1, alpha_in=0.25, alpha_out=0) forward.
    x_l_up = jnp.repeat(jnp.repeat(x_l, 2, axis=2), 2, axis=3)

    def ref(xh_, xl_, wh_, wl_):
        return (jnp.einsum("nchw,oc->nohw", xh_, wh_, preferred_element_type=jnp.float32)
                + jnp.einsum("nchw,oc->nohw", xl_, wl_, preferred_element_type=jnp.float32))

    cdt = jnp.bfloat16
    y_ref_bf16 = ref(x_h.astype(cdt), x_l_up.astype(cdt),
                     w_h2h[..., 0, 0].astype(cdt), w_l2h[..., 0, 0].astype(cdt))
    y_ref_f32 = ref(x_h, x_l_up, w_h2h[..., 0, 0], w_l2h[..., 0, 0])

    # Tight check against the same bf16-rounded inputs the kernel consumes ...
    assert jnp.allclose(y, y_ref_bf16, atol=2e-3, rtol=2e-3)
    # ... and a looser check against full-f32 math (only bf16 input quantization differs).
    assert jnp.allclose(y, y_ref_f32, atol=2e-2, rtol=2e-2)

    print("KERNEL_OK")
</pallas_src>

<mosaic_0001>
module attributes {stable_mosaic.version = 11 : i64} {
  func.func @_outconv_kernel(%arg0: i32, %arg1: i32, %arg2: memref<1x6x256xbf16, #tpu.memory_space<vmem>>, %arg3: memref<1x2x64xbf16, #tpu.memory_space<vmem>>, %arg4: memref<3x6xbf16, #tpu.memory_space<vmem>>, %arg5: memref<3x2xbf16, #tpu.memory_space<vmem>>, %arg6: memref<64x256xbf16, #tpu.memory_space<vmem>>, %arg7: memref<1x3x256xf32, #tpu.memory_space<vmem>>) attributes {dimension_semantics = [#tpu.dimension_semantics<parallel>, #tpu.dimension_semantics<parallel>], iteration_bounds = array<i64: 2, 1>, scalar_prefetch = 0 : i64, scratch_operands = 0 : i64, tpu.core_type = #tpu.core_type<tc>, window_params = [{transform_indices = @transform_0, window_bounds = array<i64: 1, 6, 256>}, {transform_indices = @transform_1, window_bounds = array<i64: 1, 2, 64>}, {pipeline_mode = #tpu.pipeline_mode<synchronous>, transform_indices = @transform_2, window_bounds = array<i64: 3, 6>}, {pipeline_mode = #tpu.pipeline_mode<synchronous>, transform_indices = @transform_3, window_bounds = array<i64: 3, 2>}, {pipeline_mode = #tpu.pipeline_mode<synchronous>, transform_indices = @transform_4, window_bounds = array<i64: 64, 256>}, {transform_indices = @transform_5, window_bounds = array<i64: 1, 3, 256>}]} {
    %c0 = arith.constant 0 : index
    %c0_0 = arith.constant 0 : index
    %c0_1 = arith.constant 0 : index
    %0 = vector.load %arg2[%c0, %c0_0, %c0_1] : memref<1x6x256xbf16, #tpu.memory_space<vmem>>, vector<1x6x256xbf16>
    %1 = vector.shape_cast %0 : vector<1x6x256xbf16> to vector<6x256xbf16>
    %c0_2 = arith.constant 0 : index
    %c0_3 = arith.constant 0 : index
    %c0_4 = arith.constant 0 : index
    %2 = vector.load %arg3[%c0_2, %c0_3, %c0_4] : memref<1x2x64xbf16, #tpu.memory_space<vmem>>, vector<1x2x64xbf16>
    %3 = vector.shape_cast %2 : vector<1x2x64xbf16> to vector<2x64xbf16>
    %c0_5 = arith.constant 0 : index
    %c0_6 = arith.constant 0 : index
    %4 = vector.load %arg6[%c0_5, %c0_6] : memref<64x256xbf16, #tpu.memory_space<vmem>>, vector<64x256xbf16>
    %cst = arith.constant dense<0.000000e+00> : vector<2x256xf32>
    %5 = tpu.matmul %3, %4, %cst {dimension_numbers = #tpu.dot_dimension_numbers<[1], [0], [0], [1], [0, 0, 1, 1], [], []>} : vector<2x64xbf16>, vector<64x256xbf16>, vector<2x256xf32> -> vector<2x256xf32>
    %6 = arith.truncf %5 : vector<2x256xf32> to vector<2x256xbf16>
    %c0_7 = arith.constant 0 : index
    %c0_8 = arith.constant 0 : index
    %7 = vector.load %arg4[%c0_7, %c0_8] : memref<3x6xbf16, #tpu.memory_space<vmem>>, vector<3x6xbf16>
    %cst_9 = arith.constant dense<0.000000e+00> : vector<3x256xf32>
    %8 = tpu.matmul %7, %1, %cst_9 {dimension_numbers = #tpu.dot_dimension_numbers<[1], [0], [0], [1], [0, 0, 1, 1], [], []>} : vector<3x6xbf16>, vector<6x256xbf16>, vector<3x256xf32> -> vector<3x256xf32>
    %c0_10 = arith.constant 0 : index
    %c0_11 = arith.constant 0 : index
    %9 = vector.load %arg5[%c0_10, %c0_11] : memref<3x2xbf16, #tpu.memory_space<vmem>>, vector<3x2xbf16>
    %cst_12 = arith.constant dense<0.000000e+00> : vector<3x256xf32>
    %10 = tpu.matmul %9, %6, %cst_12 {dimension_numbers = #tpu.dot_dimension_numbers<[1], [0], [0], [1], [0, 0, 1, 1], [], []>} : vector<3x2xbf16>, vector<2x256xbf16>, vector<3x256xf32> -> vector<3x256xf32>
    %11 = arith.addf %8, %10 : vector<3x256xf32>
    %c0_13 = arith.constant 0 : index
    %c0_14 = arith.constant 0 : index
    %c0_15 = arith.constant 0 : index
    %12 = vector.load %arg7[%c0_13, %c0_14, %c0_15] : memref<1x3x256xf32, #tpu.memory_space<vmem>>, vector<1x3x256xf32>
    %13 = vector.shape_cast %12 : vector<1x3x256xf32> to vector<3x256xf32>
    %14 = vector.shape_cast %11 : vector<3x256xf32> to vector<1x3x256xf32>
    tpu.vector_store %arg7[%c0_13, %c0_14, %c0_15], %14 {strides = array<i32>} : memref<1x3x256xf32, #tpu.memory_space<vmem>>, vector<1x3x256xf32>,
    return
  }
  func.func @transform_0(%arg0: i32, %arg1: i32) -> (i32, i32, i32) {
    %c0_i32 = arith.constant 0 : i32
    %c0_i32_0 = arith.constant 0 : i32
    return %arg0, %c0_i32, %arg1 : i32, i32, i32
  }
  func.func @transform_1(%arg0: i32, %arg1: i32) -> (i32, i32, i32) {
    %c0_i32 = arith.constant 0 : i32
    %c0_i32_0 = arith.constant 0 : i32
    return %arg0, %c0_i32, %arg1 : i32, i32, i32
  }
  func.func @transform_2(%arg0: i32, %arg1: i32) -> (i32, i32) {
    %c0_i32 = arith.constant 0 : i32
    %c0_i32_0 = arith.constant 0 : i32
    %c0_i32_1 = arith.constant 0 : i32
    return %c0_i32, %c0_i32_0 : i32, i32
  }
  func.func @transform_3(%arg0: i32, %arg1: i32) -> (i32, i32) {
    %c0_i32 = arith.constant 0 : i32
    %c0_i32_0 = arith.constant 0 : i32
    %c0_i32_1 = arith.constant 0 : i32
    return %c0_i32, %c0_i32_0 : i32, i32
  }
  func.func @transform_4(%arg0: i32, %arg1: i32) -> (i32, i32) {
    %c0_i32 = arith.constant 0 : i32
    %c0_i32_0 = arith.constant 0 : i32
    %c0_i32_1 = arith.constant 0 : i32
    return %c0_i32, %c0_i32_0 : i32, i32
  }
  func.func @transform_5(%arg0: i32, %arg1: i32) -> (i32, i32, i32) {
    %c0_i32 = arith.constant 0 : i32
    %c0_i32_0 = arith.constant 0 : i32
    return %arg0, %c0_i32, %arg1 : i32, i32, i32
  }
}

</mosaic_0001>

<bundles_post_ra>
// kernel: outconv_pallas.1
= control target key start
LH: loop header
LB: loop body
LE: loop exit
PB: predicated region body
PF: predicated region fallthrough
CT: control target
= control target key end

     0   :  { %s696_s18 = smov 0   ;;  %s698_s19 = smov 0   ;;  %s798_s0 = inlined_call_operand.vmem [shape: bf16[2,6,256], index: 0, kind: input, shape index: {}]   ;;  %s799_s1 = inlined_call_operand.vmem [shape: bf16[2,2,64], index: 1, kind: input, shape index: {}]   ;;  %s800_s2 = inlined_call_operand.vmem [shape: bf16[3,6], index: 2, kind: input, shape index: {}]   ;;  %s801_s3 = inlined_call_operand.vmem [shape: bf16[3,2], index: 3, kind: input, shape index: {}]   ;;  %s802_s4 = inlined_call_operand.vmem [shape: bf16[64,256], index: 4, kind: input, shape index: {}]   ;;  %s803_s5 = inlined_call_operand.vmem [shape: f32[2,3,256], index: 5, kind: output, shape index: {}]  }
   0x1   :  { %s700_s20 = smov 0  }
   0x2 LB: > { %s27_s21 = sadd.s32 1, %s660_s19  ;;  %p563_p0 = scmp.ge.s32.totalorder %s664_s20, 1  ;;  %s664_s20 = sphi %s700_s20, %s15_s20   ;;  %s660_s19 = sphi %s698_s19, %s805_s19   ;;  %s656_s18 = sphi %s696_s18, %s804_s18  }
   0x3   : > { %p29_p1 = scmp.ge.s32.totalorder %s27_s21, 2  ;;  %p221_p2 = scmp.lt.s32.totalorder %s664_s20, 3 }
   0x5   : > { %s807_s21 = smov (%p29_p1, %s27_s21), 0  ;;  %p222_p3 = pnand %p563_p0, %p221_p2 }
   0x6   : > { %p264_p4 = scmp.lt.s32.totalorder (!%p222_p3), %s656_s18, 1 }
   0x7   : > { %225 = sbr.rel (%p222_p3) target bundleno = 319 (0x13f), region = 40 }
   0xc   : > { %v594_v0 = vld [vmem:[%s802_s4 + $0x30] sm:$0xf]  ;;  %v617_v1 = vld [vmem:[%s802_s4 + $0x34] sm:$0xf0]  ;;  %v616_v2 = vld [vmem:[%s802_s4 + $0x34] sm:$0xf] }
   0xd   : > { %v595_v3 = vor.u32 %v617_v1, %v594_v0  ;;  %v596_v4 = vld [vmem:[%s802_s4 + $0x38] sm:$0xf0]  ;;  %v586_v5 = vld [vmem:[%s802_s4 + $0x20] sm:$0xf]  ;;  %v615_v6 = vld [vmem:[%s802_s4 + $0x24] sm:$0xf0] }
   0xe   : > { %v599_v7 = vor.u32 %v616_v2, %v596_v4  ;;  %v614_v8 = vld [vmem:[%s802_s4 + $0x24] sm:$0xf]  ;;  %v588_v9 = vld [vmem:[%s802_s4 + $0x28] sm:$0xf0]  ;;  %v587_v10 = vor.u32 %v615_v6, %v586_v5  ;;  %v578_v12 = vld [vmem:[%s802_s4 + $0x10] sm:$0xf] }
   0xf   : > { %348 = vmatpush.bf16.msra.mxu0 %v595_v3  ;;  %v591_v11 = vor.u32 %v614_v8, %v588_v9  ;;  %v613_v13 = vld [vmem:[%s802_s4 + $0x14] sm:$0xf0]  ;;  %v612_v14 = vld [vmem:[%s802_s4 + $0x14] sm:$0xf]  ;;  %v580_v15 = vld [vmem:[%s802_s4 + $0x18] sm:$0xf0] }
  0x10   : > { %361 = vmatpush.bf16.msra.mxu1 %v599_v7  ;;  %v579_v16 = vor.u32 %v613_v13, %v578_v12  ;;  %v583_v17 = vor.u32 %v612_v14, %v580_v15  ;;  %v570_v18 = vld [vmem:[%s802_s4] sm:$0xf]  ;;  %v611_v19 = vld [vmem:[%s802_s4 + $0x4] sm:$0xf0]  ;;  %s809_s18 = smov (!%p264_p4, %s656_s18), 1  ;;  %vm340_vm0 = vcmask 523264  }
  0x11   : > { %v610_v20 = vld [vmem:[%s802_s4 + $0x4] sm:$0xf]  ;;  %v572_v21 = vld [vmem:[%s802_s4 + $0x8] sm:$0xf0]  ;;  %v571_v22 = vor.u32 %v611_v19, %v570_v18  ;;  %s278_s10 = scalar_lea.vmem %s799_s1, %s809_s18  ;;  %s608_s11 = sshll.u32 %s809_s18, 3  ;;  %vm420_vm1 = vcmask 1042432  }
  0x12   : > { %v575_v23 = vor.u32 %v610_v20, %v572_v21  ;;  %v291_v24 = vld [vmem:[%s278_s10] sm:$0x1]  ;;  %s271_s14 = scalar_lea.vmem %s798_s0, %s608_s11  ;;  %vm378_vm2 = vcmask 1040384   ;;  %vm374_vm3 = vcmask 15360   ;;  %vm416_vm4 = vcmask 48128   ;;  %s287_s25 = scalar_lea.vmem %s803_s5, %s608_s11 }
  0x13   : > { %349 = vmatpush.bf16.msra.mxu0 %v587_v10  ;;  %v290_v25 = vld [vmem:[%s271_s14] sm:$0x77]  ;;  %vm456_vm5 = vcmask 1043456  }
  0x14   : > { %362 = vmatpush.bf16.msra.mxu1 %v591_v11  ;;  %v412_v26 = vunpack.c.l.b16 %v290_v25  ;;  %v413_v27 = vunpack.c.h.b16 %v290_v25  ;;  %v373_v38 = vld [vmem:[%s801_s3] sm:$0x3] }
  0x15   : > { %v372_v41 = vld [vmem:[%s800_s2] sm:$0x3] }
  0x16   : > { %v414_v28 = vpack.c.b16 %v412_v26, %v412_v26  ;;  %v415_v29 = vpack.c.b16 %v413_v27, %v413_v27 }
  0x17   : > { %350 = vmatpush.bf16.msra.mxu0 %v579_v16 }
  0x18   : > { %363 = vmatpush.bf16.msra.mxu1 %v583_v17  ;;  %v422_v34 = vsel %vm420_vm1, %v414_v28, 0  ;;  %v425_v36 = vsel %vm420_vm1, %v415_v29, 0 }
  0x1b   : > { %351 = vmatpush.bf16.msra.mxu0 %v571_v22 }
  0x1c   : > { %364 = vmatpush.bf16.msra.mxu1 %v575_v23 }
  0x1e   : > { %600 = vmatmul.msk.bf16.vlgmr.msra.gmra.mxu0 %vm340_vm0, %v291_v24 }
  0x1f   : > { %601 = vmatmul.msk.bf16.vlgmr.msra.gmra.mxu1 %vm340_vm0, %v291_v24 }
  0x9b   : > { %v353_v30 = vpop.f32.mrf.mxu0 }
  0x9c   : > { %v370_v31 = vpack.c.bf16 %v353_v30, %v353_v30  ;;  %v366_v32 = vpop.f32.mrf.mxu1 }
  0x9d   : > { %v371_v33 = vpack.c.bf16 %v366_v32, %v366_v32 }
  0x9e   : > { %v380_v35 = vsel %vm378_vm2, %v370_v31, 0 }
  0x9f   : > { %392 = vmatpush.bf16.msra.mxu2 %v380_v35  ;;  %v383_v37 = vsel %vm378_vm2, %v371_v33, 0 }
  0xa0   : > { %405 = vmatpush.bf16.msra.mxu3 %v383_v37 }
  0xa2   : > { %602 = vmatmul.msk.bf16.vlgmr.msra.gmra.mxu2 %vm374_vm3, %v373_v38 }
  0xa3   : > { %434 = vmatpush.bf16.msrb.mxu2 %v422_v34  ;;  %603 = vmatmul.msk.bf16.vlgmr.msra.gmra.mxu3 %vm374_vm3, %v373_v38  ;;  %v355_v39 = vpop.f32.mrf.mxu0 }
  0xa4   : > { %447 = vmatpush.bf16.msrb.mxu3 %v425_v36  ;;  %v368_v40 = vpop.f32.mrf.mxu1 }
  0xb2   : > { %604 = vmatmul.msk.bf16.vlgmr.msrb.gmra.mxu2 %vm416_vm4, %v372_v41 }
  0xb3   : > { %605 = vmatmul.msk.bf16.vlgmr.msrb.gmra.mxu3 %vm416_vm4, %v372_v41 }
 0x125   : > { %v394_v42 = vpop.f32.mrf.mxu2 }
 0x126   : > { %v407_v43 = vpop.f32.mrf.mxu3 }
 0x12d   : > { %v396_v44 = vpop.f32.mrf.mxu2 }
 0x12e   : > { %v409_v45 = vpop.f32.mrf.mxu3 }
 0x135   : > { %v436_v46 = vpop.f32.mrf.mxu2 }
 0x136   : > { %v449_v47 = vpop.f32.mrf.mxu3  ;;  %v437_v49 = vadd.f32 %v436_v46, %v394_v42 }
 0x137   : > { %v450_v48 = vadd.f32 %v449_v47, %v407_v43 }
 0x139   : > { %v455_v50 = vrot.slane %v450_v48, 4 }
 0x13b   : > { %v457_v51 = vsel %vm456_vm5, %v437_v49, %v455_v50 }
 0x13c   : > { %459 = vst [vmem:[%s287_s25] sm:$0x77] %v457_v51 }
 0x13d   : > { %v438_v52 = vpop.f32.mrf.mxu2 }
 0x13e   : > { %v451_v53 = vpop.f32.mrf.mxu3 }
 0x13f PF: > { %s15_s20 = sadd.s32 1, %s664_s20   ;;  %s804_s18 = smov %s660_s19 }
 0x140   : > { %p12_p5 = scmp.ge.s32.totalorder %s15_s20, 4   ;;  %s805_s19 = smov %s807_s21 }
 0x142   :  { %14 = sbr.rel (!%p12_p5) target bundleno = 2 (0x2), region = 73 }

</bundles_post_ra>
